<compile_context>
chip_gen: v7x
topology: tpu7x:2x2x1
jax: 0.10.0
libtpu: 0.0.40
codegen_flags: <defaults>
</compile_context>

<pallas_src>
import numpy as np
import jax
import jax.numpy as jnp
from jax.experimental import pallas as pl
from jax.experimental.pallas import tpu as pltpu

N_QUBITS = 4
N_LAYERS = 2
DIM = 1 << N_QUBITS          # 16-dim Hilbert space
STATE_DIM = 32
HIDDEN = 64
N_ACTIONS = 8


# ---------------------------------------------------------------------------
# Host-side constant gate-structure matrices (used only for parameter packing,
# never shipped to the kernel).
# Convention: qubit q <-> bit q of the basis index; psi kept as a ROW vector,
# psi' = psi @ M with M[b, f(b)] = 1 for a classical basis permutation f.
# ---------------------------------------------------------------------------
def _bitflip_perm_matrices():
    mats = np.zeros((N_QUBITS, DIM, DIM), np.float32)
    for q in range(N_QUBITS):
        for b in range(DIM):
            mats[q, b, b ^ (1 << q)] = 1.0
    return mats


def _ring_cnot_matrix():
    # Sequential CNOT(0,1), CNOT(1,2), CNOT(2,3), CNOT(3,0) (BasicEntanglerLayers ring)
    m = np.zeros((DIM, DIM), np.float32)
    for b in range(DIM):
        s = b
        for c in range(N_QUBITS):
            t = (c + 1) % N_QUBITS
            if (s >> c) & 1:
                s ^= (1 << t)
        m[b, s] = 1.0
    return m


def _z_sign_matrix():
    s = np.zeros((DIM, N_QUBITS), np.float32)
    for b in range(DIM):
        for q in range(N_QUBITS):
            s[b, q] = 1.0 - 2.0 * ((b >> q) & 1)
    return s


def _entangler_unitary32(qp):
    """Fold the 2 BasicEntanglerLayers (RX(qp) per qubit + CNOT ring) into one
    real 32x32 matrix acting on the row vector [Re(psi) | Im(psi)].
    Recomputed only when qp changes (plain JAX, outside the Pallas kernel)."""
    xp = _bitflip_perm_matrices()                 # (4, 16, 16) numpy
    ring = _ring_cnot_matrix()                    # (16, 16) numpy
    eye = np.eye(DIM, dtype=np.float32)
    ur = jnp.asarray(eye)                         # accumulated U, real part
    ui = jnp.zeros((DIM, DIM), jnp.float32)       # accumulated U, imag part
    for l in range(N_LAYERS):
        for q in range(N_QUBITS):
            c = jnp.cos(0.5 * qp[l, q])
            s = jnp.sin(0.5 * qp[l, q])
            gr = c * eye                          # gate G = c*I - i*s*Xq
            gi = -s * xp[q]
            ur, ui = ur @ gr - ui @ gi, ur @ gi + ui @ gr   # U <- U @ G
        ur = ur @ ring
        ui = ui @ ring
    # [r | i] @ [[Ur, Ui], [-Ui, Ur]] = [r@Ur - i@Ui, r@Ui + i@Ur]
    top = jnp.concatenate([ur, ui], axis=1)
    bot = jnp.concatenate([-ui, ur], axis=1)
    return jnp.concatenate([top, bot], axis=0).astype(jnp.float32)   # (32, 32)


def pack_params(params):
    """Pack all weights into 4 contiguous kernel inputs (bias = last row)."""
    w1t, b1, w2t, b2, qp, w3t, b3 = params
    zsign = jnp.asarray(_z_sign_matrix())                     # (16, 4)
    wb1 = jnp.concatenate([w1t, b1], axis=0)                  # (33, 64)
    wb2 = jnp.concatenate([w2t, b2], axis=0)                  # (65, 4)
    u32 = _entangler_unitary32(qp)                            # (32, 32)
    wz = zsign @ w3t                                          # (16, 8)  zsign folded into fc3
    wb3 = jnp.concatenate([wz, wz, b3], axis=0)               # (33, 8)  [Wz; Wz; b3]
    return wb1, wb2, u32, wb3


# ---------------------------------------------------------------------------
# Pallas kernel
# ---------------------------------------------------------------------------
def qrdqn_kernel(x_ref, wb1_ref, wb2_ref, u_ref, wb3_ref, out_ref):
    # fc1 + relu (bias = last row of wb1)
    x = x_ref[...]                                                       # (1, 32)
    h = (jnp.dot(x, wb1_ref[:STATE_DIM, :], preferred_element_type=jnp.float32)
         + wb1_ref[STATE_DIM:STATE_DIM + 1, :])
    h = jnp.maximum(h, 0.0)                                              # (1, 64)

    # fc2 + relu -> RX embedding angles
    ang = (jnp.dot(h, wb2_ref[:HIDDEN, :], preferred_element_type=jnp.float32)
           + wb2_ref[HIDDEN:HIDDEN + 1, :])
    ang = jnp.maximum(ang, 0.0)                                          # (1, 4)

    # All transcendentals in two vector EUP ops.
    c = jnp.cos(0.5 * ang)                                               # (1, 4)
    s = jnp.sin(0.5 * ang)                                               # (1, 4)

    # AngleEmbedding on |0000> is a product state:
    #   psi[b] = (-i)^popcount(b) * prod_q (c_q if bit_q(b)==0 else s_q)
    # Build it directly as a (1, 32) real vector [Re(psi) | Im(psi)] on the VPU.
    idx = jax.lax.broadcasted_iota(jnp.int32, (1, 2 * DIM), 1)
    basis = idx & (DIM - 1)                                              # basis index b
    imag_half = (idx >= DIM).astype(jnp.float32)                         # 0 -> Re, 1 -> Im

    mag = None
    pc = jnp.zeros((1, 2 * DIM), jnp.int32)
    for q in range(N_QUBITS):
        bit = (basis >> q) & 1
        pc = pc + bit
        bitf = bit.astype(jnp.float32)
        cq = c[:, q:q + 1]                                               # (1, 1)
        sq = s[:, q:q + 1]                                               # (1, 1)
        fac = cq + (sq - cq) * bitf                                      # (1, 32)
        mag = fac if mag is None else mag * fac
    pm = pc & 3                                                          # popcount mod 4
    re_ph = (pm == 0).astype(jnp.float32) - (pm == 2).astype(jnp.float32)
    im_ph = (pm == 3).astype(jnp.float32) - (pm == 1).astype(jnp.float32)
    psi = mag * (re_ph * (1.0 - imag_half) + im_ph * imag_half)          # (1, 32)

    # State-independent entangler folded into one 32x32 real matrix: single MXU dot.
    psi = jnp.dot(psi, u_ref[...], preferred_element_type=jnp.float32)   # (1, 32)

    # <Z> projection + fc3 fused: out = [Re^2 | Im^2] @ [Wz; Wz] + b3
    sq32 = psi * psi                                                     # (1, 32)
    out_ref[...] = (jnp.dot(sq32, wb3_ref[:2 * DIM, :],
                            preferred_element_type=jnp.float32)
                    + wb3_ref[2 * DIM:2 * DIM + 1, :])


# ---------------------------------------------------------------------------
# Wrapper
# ---------------------------------------------------------------------------
def qrdqn_forward(state, params):
    wb1, wb2, u32, wb3 = pack_params(params)   # in a training loop: cache until params change
    x = state.reshape(1, -1).astype(jnp.float32)                          # state.view(1, -1)

    vmem = pl.BlockSpec(memory_space=pltpu.MemorySpace.VMEM)
    return pl.pallas_call(
        qrdqn_kernel,
        out_shape=jax.ShapeDtypeStruct((1, N_ACTIONS), jnp.float32),
        in_specs=[vmem] * 5,
        out_specs=vmem,
    )(x, wb1, wb2, u32, wb3)


# ---------------------------------------------------------------------------
# Pure NumPy reference (complex statevector) for correctness check
# ---------------------------------------------------------------------------
def reference_forward(state, params):
    w1t, b1, w2t, b2, qp, w3t, b3 = [np.asarray(p, np.float64) for p in params]
    x = np.asarray(state, np.float64).reshape(1, -1)
    h = np.maximum(x @ w1t + b1, 0.0)
    ang = np.maximum(h @ w2t + b2, 0.0)[0]

    psi = np.zeros(DIM, np.complex128)
    psi[0] = 1.0
    idx = np.arange(DIM)

    def rx(psi, theta, q):
        c, s = np.cos(theta / 2.0), np.sin(theta / 2.0)
        return c * psi - 1j * s * psi[idx ^ (1 << q)]

    def cnot(psi, c, t):
        g = np.where((idx >> c) & 1, idx ^ (1 << t), idx)
        return psi[g]

    for q in range(N_QUBITS):
        psi = rx(psi, ang[q], q)
    for l in range(N_LAYERS):
        for q in range(N_QUBITS):
            psi = rx(psi, qp[l, q], q)
        for c in range(N_QUBITS):
            psi = cnot(psi, c, (c + 1) % N_QUBITS)

    probs = np.abs(psi) ** 2
    expz = np.array([np.sum(probs * (1 - 2 * ((idx >> q) & 1)))
                     for q in range(N_QUBITS)])
    return expz.reshape(1, -1) @ w3t + b3


# ---------------------------------------------------------------------------
def init_params(key):
    k1, k2, k3, k4, k5, k6, k7 = jax.random.split(key, 7)
    # nn.Linear weights stored transposed (in_features, out_features) for x @ Wt + b
    w1t = jax.random.normal(k1, (STATE_DIM, HIDDEN), jnp.float32) * 0.1
    b1 = jax.random.normal(k2, (1, HIDDEN), jnp.float32) * 0.05
    w2t = jax.random.normal(k3, (HIDDEN, N_QUBITS), jnp.float32) * 0.1
    b2 = jax.random.normal(k4, (1, N_QUBITS), jnp.float32) * 0.05
    # TorchLayer default init: uniform(0, 2*pi)
    qp = jax.random.uniform(k5, (N_LAYERS, N_QUBITS), jnp.float32,
                            minval=0.0, maxval=2.0 * np.pi)
    w3t = jax.random.normal(k6, (N_QUBITS, N_ACTIONS), jnp.float32) * 0.1
    b3 = jax.random.normal(k7, (1, N_ACTIONS), jnp.float32) * 0.05
    return (w1t, b1, w2t, b2, qp, w3t, b3)


if __name__ == "__main__":
    key = jax.random.PRNGKey(0)
    pkey, skey = jax.random.split(key)
    params = init_params(pkey)
    state = jax.random.normal(skey, (STATE_DIM,), jnp.float32)

    q_values = qrdqn_forward(state, params)
    q_values = jax.block_until_ready(q_values)

    q_ref = reference_forward(np.asarray(state), params)
    np.testing.assert_allclose(np.asarray(q_values), q_ref, rtol=1e-4, atol=1e-4)

    print("KERNEL_OK")
</pallas_src>

<mosaic_0001>
module attributes {stable_mosaic.version = 11 : i64} {
  func.func @qrdqn_kernel(%arg0: memref<1x32xf32, #tpu.memory_space<vmem>>, %arg1: memref<33x64xf32, #tpu.memory_space<vmem>>, %arg2: memref<65x4xf32, #tpu.memory_space<vmem>>, %arg3: memref<32x32xf32, #tpu.memory_space<vmem>>, %arg4: memref<33x8xf32, #tpu.memory_space<vmem>>, %arg5: memref<1x8xf32, #tpu.memory_space<vmem>>) attributes {dimension_semantics = [], scalar_prefetch = 0 : i64, scratch_operands = 0 : i64, tpu.core_type = #tpu.core_type<tc>} {
    %c0 = arith.constant 0 : index
    %c0_0 = arith.constant 0 : index
    %0 = vector.load %arg0[%c0, %c0_0] : memref<1x32xf32, #tpu.memory_space<vmem>>, vector<1x32xf32>
    %c0_1 = arith.constant 0 : index
    %c0_2 = arith.constant 0 : index
    %1 = vector.load %arg1[%c0_1, %c0_2] : memref<33x64xf32, #tpu.memory_space<vmem>>, vector<32x64xf32>
    %cst = arith.constant dense<0.000000e+00> : vector<1x64xf32>
    %2 = tpu.matmul %0, %1, %cst {dimension_numbers = #tpu.dot_dimension_numbers<[1], [0], [0], [1], [0, 0, 1, 1], [], []>} : vector<1x32xf32>, vector<32x64xf32>, vector<1x64xf32> -> vector<1x64xf32>
    %c32 = arith.constant 32 : index
    %c0_3 = arith.constant 0 : index
    %3 = vector.load %arg1[%c32, %c0_3] : memref<33x64xf32, #tpu.memory_space<vmem>>, vector<1x64xf32>
    %4 = arith.addf %2, %3 : vector<1x64xf32>
    %cst_4 = arith.constant 0.000000e+00 : f32
    %5 = vector.broadcast %cst_4 : f32 to vector<1x64xf32>
    %6 = arith.maximumf %4, %5 : vector<1x64xf32>
    %c0_5 = arith.constant 0 : index
    %c0_6 = arith.constant 0 : index
    %7 = vector.load %arg2[%c0_5, %c0_6] : memref<65x4xf32, #tpu.memory_space<vmem>>, vector<64x4xf32>
    %cst_7 = arith.constant dense<0.000000e+00> : vector<1x4xf32>
    %8 = tpu.matmul %6, %7, %cst_7 {dimension_numbers = #tpu.dot_dimension_numbers<[1], [0], [0], [1], [0, 0, 1, 1], [], []>} : vector<1x64xf32>, vector<64x4xf32>, vector<1x4xf32> -> vector<1x4xf32>
    %c64 = arith.constant 64 : index
    %c0_8 = arith.constant 0 : index
    %9 = vector.load %arg2[%c64, %c0_8] : memref<65x4xf32, #tpu.memory_space<vmem>>, vector<1x4xf32>
    %10 = arith.addf %8, %9 : vector<1x4xf32>
    %cst_9 = arith.constant 0.000000e+00 : f32
    %11 = vector.broadcast %cst_9 : f32 to vector<1x4xf32>
    %12 = arith.maximumf %10, %11 : vector<1x4xf32>
    %cst_10 = arith.constant 5.000000e-01 : f32
    %13 = vector.broadcast %cst_10 : f32 to vector<1x4xf32>
    %14 = arith.mulf %13, %12 : vector<1x4xf32>
    %15 = math.cos %14 : vector<1x4xf32>
    %cst_11 = arith.constant 5.000000e-01 : f32
    %16 = vector.broadcast %cst_11 : f32 to vector<1x4xf32>
    %17 = arith.mulf %16, %12 : vector<1x4xf32>
    %18 = math.sin %17 : vector<1x4xf32>
    %19 = tpu.iota {dimensions = array<i32: 1>} : vector<1x32xi32>
    %c15_i32 = arith.constant 15 : i32
    %20 = vector.broadcast %c15_i32 : i32 to vector<1x32xi32>
    %21 = arith.andi %19, %20 : vector<1x32xi32>
    %c16_i32 = arith.constant 16 : i32
    %22 = vector.broadcast %c16_i32 : i32 to vector<1x32xi32>
    %23 = arith.cmpi sge, %19, %22 : vector<1x32xi32>
    %24 = arith.extui %23 : vector<1x32xi1> to vector<1x32xi32>
    %25 = arith.sitofp %24 : vector<1x32xi32> to vector<1x32xf32>
    %c0_i32 = arith.constant 0 : i32
    %26 = vector.broadcast %c0_i32 : i32 to vector<1x32xi32>
    %c0_i32_12 = arith.constant 0 : i32
    %27 = vector.broadcast %c0_i32_12 : i32 to vector<1x32xi32>
    %28 = arith.shrsi %21, %27 : vector<1x32xi32>
    %c1_i32 = arith.constant 1 : i32
    %29 = vector.broadcast %c1_i32 : i32 to vector<1x32xi32>
    %30 = arith.andi %28, %29 : vector<1x32xi32>
    %31 = arith.addi %26, %30 : vector<1x32xi32>
    %32 = arith.sitofp %30 : vector<1x32xi32> to vector<1x32xf32>
    %33 = vector.extract_strided_slice %15 {offsets = [0, 0], sizes = [1, 1], strides = [1, 1]} : vector<1x4xf32> to vector<1x1xf32>
    %34 = vector.extract_strided_slice %18 {offsets = [0, 0], sizes = [1, 1], strides = [1, 1]} : vector<1x4xf32> to vector<1x1xf32>
    %35 = arith.subf %34, %33 : vector<1x1xf32>
    %36 = vector.broadcast %35 : vector<1x1xf32> to vector<1x32xf32>
    %37 = arith.mulf %36, %32 : vector<1x32xf32>
    %38 = vector.broadcast %33 : vector<1x1xf32> to vector<1x32xf32>
    %39 = arith.addf %38, %37 : vector<1x32xf32>
    %c1_i32_13 = arith.constant 1 : i32
    %40 = vector.broadcast %c1_i32_13 : i32 to vector<1x32xi32>
    %41 = arith.shrsi %21, %40 : vector<1x32xi32>
    %c1_i32_14 = arith.constant 1 : i32
    %42 = vector.broadcast %c1_i32_14 : i32 to vector<1x32xi32>
    %43 = arith.andi %41, %42 : vector<1x32xi32>
    %44 = arith.addi %31, %43 : vector<1x32xi32>
    %45 = arith.sitofp %43 : vector<1x32xi32> to vector<1x32xf32>
    %46 = vector.extract_strided_slice %15 {offsets = [0, 1], sizes = [1, 1], strides = [1, 1]} : vector<1x4xf32> to vector<1x1xf32>
    %47 = vector.extract_strided_slice %18 {offsets = [0, 1], sizes = [1, 1], strides = [1, 1]} : vector<1x4xf32> to vector<1x1xf32>
    %48 = arith.subf %47, %46 : vector<1x1xf32>
    %49 = vector.broadcast %48 : vector<1x1xf32> to vector<1x32xf32>
    %50 = arith.mulf %49, %45 : vector<1x32xf32>
    %51 = vector.broadcast %46 : vector<1x1xf32> to vector<1x32xf32>
    %52 = arith.addf %51, %50 : vector<1x32xf32>
    %53 = arith.mulf %39, %52 : vector<1x32xf32>
    %c2_i32 = arith.constant 2 : i32
    %54 = vector.broadcast %c2_i32 : i32 to vector<1x32xi32>
    %55 = arith.shrsi %21, %54 : vector<1x32xi32>
    %c1_i32_15 = arith.constant 1 : i32
    %56 = vector.broadcast %c1_i32_15 : i32 to vector<1x32xi32>
    %57 = arith.andi %55, %56 : vector<1x32xi32>
    %58 = arith.addi %44, %57 : vector<1x32xi32>
    %59 = arith.sitofp %57 : vector<1x32xi32> to vector<1x32xf32>
    %60 = vector.extract_strided_slice %15 {offsets = [0, 2], sizes = [1, 1], strides = [1, 1]} : vector<1x4xf32> to vector<1x1xf32>
    %61 = vector.extract_strided_slice %18 {offsets = [0, 2], sizes = [1, 1], strides = [1, 1]} : vector<1x4xf32> to vector<1x1xf32>
    %62 = arith.subf %61, %60 : vector<1x1xf32>
    %63 = vector.broadcast %62 : vector<1x1xf32> to vector<1x32xf32>
    %64 = arith.mulf %63, %59 : vector<1x32xf32>
    %65 = vector.broadcast %60 : vector<1x1xf32> to vector<1x32xf32>
    %66 = arith.addf %65, %64 : vector<1x32xf32>
    %67 = arith.mulf %53, %66 : vector<1x32xf32>
    %c3_i32 = arith.constant 3 : i32
    %68 = vector.broadcast %c3_i32 : i32 to vector<1x32xi32>
    %69 = arith.shrsi %21, %68 : vector<1x32xi32>
    %c1_i32_16 = arith.constant 1 : i32
    %70 = vector.broadcast %c1_i32_16 : i32 to vector<1x32xi32>
    %71 = arith.andi %69, %70 : vector<1x32xi32>
    %72 = arith.addi %58, %71 : vector<1x32xi32>
    %73 = arith.sitofp %71 : vector<1x32xi32> to vector<1x32xf32>
    %74 = vector.extract_strided_slice %15 {offsets = [0, 3], sizes = [1, 1], strides = [1, 1]} : vector<1x4xf32> to vector<1x1xf32>
    %75 = vector.extract_strided_slice %18 {offsets = [0, 3], sizes = [1, 1], strides = [1, 1]} : vector<1x4xf32> to vector<1x1xf32>
    %76 = arith.subf %75, %74 : vector<1x1xf32>
    %77 = vector.broadcast %76 : vector<1x1xf32> to vector<1x32xf32>
    %78 = arith.mulf %77, %73 : vector<1x32xf32>
    %79 = vector.broadcast %74 : vector<1x1xf32> to vector<1x32xf32>
    %80 = arith.addf %79, %78 : vector<1x32xf32>
    %81 = arith.mulf %67, %80 : vector<1x32xf32>
    %c3_i32_17 = arith.constant 3 : i32
    %82 = vector.broadcast %c3_i32_17 : i32 to vector<1x32xi32>
    %83 = arith.andi %72, %82 : vector<1x32xi32>
    %c0_i32_18 = arith.constant 0 : i32
    %84 = vector.broadcast %c0_i32_18 : i32 to vector<1x32xi32>
    %85 = arith.cmpi eq, %83, %84 : vector<1x32xi32>
    %86 = arith.extui %85 : vector<1x32xi1> to vector<1x32xi32>
    %87 = arith.sitofp %86 : vector<1x32xi32> to vector<1x32xf32>
    %c2_i32_19 = arith.constant 2 : i32
    %88 = vector.broadcast %c2_i32_19 : i32 to vector<1x32xi32>
    %89 = arith.cmpi eq, %83, %88 : vector<1x32xi32>
    %90 = arith.extui %89 : vector<1x32xi1> to vector<1x32xi32>
    %91 = arith.sitofp %90 : vector<1x32xi32> to vector<1x32xf32>
    %92 = arith.subf %87, %91 : vector<1x32xf32>
    %c3_i32_20 = arith.constant 3 : i32
    %93 = vector.broadcast %c3_i32_20 : i32 to vector<1x32xi32>
    %94 = arith.cmpi eq, %83, %93 : vector<1x32xi32>
    %95 = arith.extui %94 : vector<1x32xi1> to vector<1x32xi32>
    %96 = arith.sitofp %95 : vector<1x32xi32> to vector<1x32xf32>
    %c1_i32_21 = arith.constant 1 : i32
    %97 = vector.broadcast %c1_i32_21 : i32 to vector<1x32xi32>
    %98 = arith.cmpi eq, %83, %97 : vector<1x32xi32>
    %99 = arith.extui %98 : vector<1x32xi1> to vector<1x32xi32>
    %100 = arith.sitofp %99 : vector<1x32xi32> to vector<1x32xf32>
    %101 = arith.subf %96, %100 : vector<1x32xf32>
    %cst_22 = arith.constant 1.000000e+00 : f32
    %102 = vector.broadcast %cst_22 : f32 to vector<1x32xf32>
    %103 = arith.subf %102, %25 : vector<1x32xf32>
    %104 = arith.mulf %92, %103 : vector<1x32xf32>
    %105 = arith.mulf %101, %25 : vector<1x32xf32>
    %106 = arith.addf %104, %105 : vector<1x32xf32>
    %107 = arith.mulf %81, %106 : vector<1x32xf32>
    %c0_23 = arith.constant 0 : index
    %c0_24 = arith.constant 0 : index
    %108 = vector.load %arg3[%c0_23, %c0_24] : memref<32x32xf32, #tpu.memory_space<vmem>>, vector<32x32xf32>
    %cst_25 = arith.constant dense<0.000000e+00> : vector<1x32xf32>
    %109 = tpu.matmul %107, %108, %cst_25 {dimension_numbers = #tpu.dot_dimension_numbers<[1], [0], [0], [1], [0, 0, 1, 1], [], []>} : vector<1x32xf32>, vector<32x32xf32>, vector<1x32xf32> -> vector<1x32xf32>
    %110 = arith.mulf %109, %109 : vector<1x32xf32>
    %c0_26 = arith.constant 0 : index
    %c0_27 = arith.constant 0 : index
    %111 = vector.load %arg4[%c0_26, %c0_27] : memref<33x8xf32, #tpu.memory_space<vmem>>, vector<32x8xf32>
    %cst_28 = arith.constant dense<0.000000e+00> : vector<1x8xf32>
    %112 = tpu.matmul %110, %111, %cst_28 {dimension_numbers = #tpu.dot_dimension_numbers<[1], [0], [0], [1], [0, 0, 1, 1], [], []>} : vector<1x32xf32>, vector<32x8xf32>, vector<1x8xf32> -> vector<1x8xf32>
    %c32_29 = arith.constant 32 : index
    %c0_30 = arith.constant 0 : index
    %113 = vector.load %arg4[%c32_29, %c0_30] : memref<33x8xf32, #tpu.memory_space<vmem>>, vector<1x8xf32>
    %114 = arith.addf %112, %113 : vector<1x8xf32>
    %c0_31 = arith.constant 0 : index
    %c0_32 = arith.constant 0 : index
    %115 = vector.load %arg5[%c0_31, %c0_32] : memref<1x8xf32, #tpu.memory_space<vmem>>, vector<1x8xf32>
    tpu.vector_store %arg5[%c0_31, %c0_32], %114 {strides = array<i32>} : memref<1x8xf32, #tpu.memory_space<vmem>>, vector<1x8xf32>,
    return
  }
}

</mosaic_0001>

<bundles_post_ra>
// kernel: tpu_custom_call.1
= control target key start
LH: loop header
LB: loop body
LE: loop exit
PB: predicated region body
PF: predicated region fallthrough
CT: control target
= control target key end

     0   :  { %v829_v3 = vmov 0.0|0.0   ;;  %vm830_vm0 = vmmov 0   ;;  %v831_v6 = vmov 0.0   ;;  %s1004_s0 = inlined_call_operand.vmem [shape: f32[1,32], index: 0, kind: input, shape index: {}]   ;;  %s1005_s1 = inlined_call_operand.vmem [shape: f32[33,64], index: 1, kind: input, shape index: {}]   ;;  %s1006_s2 = inlined_call_operand.vmem [shape: f32[65,4], index: 2, kind: input, shape index: {}]   ;;  %s1007_s3 = inlined_call_operand.vmem [shape: f32[32,32], index: 3, kind: input, shape index: {}]   ;;  %s1008_s4 = inlined_call_operand.vmem [shape: f32[33,8], index: 4, kind: input, shape index: {}]   ;;  %s1009_s5 = inlined_call_operand.hbm [shape: f32[1,8], index: 5, kind: output, shape index: {}]  }
   0x1   :  { %v22_v0 = vld [vmem:[%s1005_s1] sm:$0xff]  ;;  %v23_v1 = vld [vmem:[%s1005_s1 + $0x8] sm:$0xff]  ;;  %v24_v2 = vld [vmem:[%s1005_s1 + $0x10] sm:$0xff]  ;;  %745 = vmatprep.subr.bf16.mxu0 %v829_v3  ;;  %701 = vmatprep.mubr.msk.f32.mxu0 %vm830_vm0, %v831_v6 }
   0x2   :  { %v746_v4 = vpack.c.bf16 %v23_v1, %v22_v0  ;;  %v25_v5 = vld [vmem:[%s1005_s1 + $0x18] sm:$0xff]  ;;  %v102_v7 = vld [vmem:[%s1006_s2] sm:$0xff]  ;;  %751 = vmatprep.subr.bf16.mxu1 %v829_v3  ;;  %v103_v8 = vld [vmem:[%s1006_s2 + $0x8] sm:$0xff]  ;;  %720 = vmatprep.mubr.msk.f32.mxu1 %vm830_vm0, %v831_v6 }
   0x3   :  { %v104_v9 = vld [vmem:[%s1006_s2 + $0x10] sm:$0xff]  ;;  %v105_v10 = vld [vmem:[%s1006_s2 + $0x18] sm:$0xff]  ;;  %v749_v11 = vpack.c.bf16 %v25_v5, %v24_v2  ;;  %v752_v12 = vpack.c.bf16 %v103_v8, %v102_v7 }
   0x4   :  { %747 = vmatpush3.bf16.msra.mxu0 %v746_v4 }
   0x5   :  { %748 = vmatprep.subr.bf16.mxu0 %v829_v3 }
   0x6   :  { %10 = vsyncpa [#allocation3], 0  ;;  %753 = vmatpush3.bf16.msra.mxu1 %v752_v12  ;;  %v755_v13 = vpack.c.bf16 %v105_v10, %v104_v9  ;;  %v106_v14 = vld [vmem:[%s1006_s2 + $0x20] sm:$0xff]  ;;  %v107_v15 = vld [vmem:[%s1006_s2 + $0x28] sm:$0xff]  ;;  %vm27_vm1 = vcmask 261120   ;;  %vm111_vm2 = vcmask 523264  }
   0x7   :  { %754 = vmatprep.subr.bf16.mxu1 %v829_v3  ;;  %v21_v16 = vld [vmem:[%s1004_s0] sm:$0x1]  ;;  %v758_v17 = vpack.c.bf16 %v107_v15, %v106_v14  ;;  %v108_v18 = vld [vmem:[%s1006_s2 + $0x30] sm:$0xff]  ;;  %v109_v19 = vld [vmem:[%s1006_s2 + $0x38] sm:$0xff]  ;;  %v832_v26 = vmov 0   ;;  %s842_s12 = smov [#allocation2]  }
   0x8   :  { %750 = vmatpush3.bf16.msra.mxu0 %v749_v11  ;;  %v761_v20 = vpack.c.bf16 %v109_v19, %v108_v18  ;;  %v26_v21 = vld [vmem:[%s1005_s1 + $0x20] sm:$0x1]  ;;  %793 = vset.pattern.permute.xlu1 %v832_v26  ;;  %v833_v43 = vmov 683565275   ;;  %v834_v45 = vmov 2475754826  }
   0x9   :  { %763 = vmatprep.subr.bf16.mxu0 %v829_v3  ;;  %795 = vset.pattern.permute.xlu0 %v832_v26  ;;  %v110_v27 = vld [vmem:[%s1006_s2 + $0x40] sm:$0x1]  ;;  %v835_v48 = vmov 2131351028   ;;  %v836_v51 = vmov 2102212464  }
   0xa   :  { %756 = vmatpush3.bf16.msra.mxu1 %v755_v13  ;;  %v837_v54 = vmov 920167782   ;;  %v838_v57 = vmov 1326507024   ;;  %s644_s13 = sshll.u32 %s842_s12, 4  ;;  %s645_s13 = int_to_ptr.vmem [resolvable:$true] %s644_s13 }
   0xb   :  { %702 = vmatmul.mubr.msk.f32.vlgmr.msra.gmra.mrb[0].mxu0 %vm27_vm1, %v21_v16  ;;  %757 = vmatprep.subr.bf16.mxu1 %v829_v3  ;;  %s805_s14 = scalar_lea.vmem %s645_s13, 16  ;;  %s809_s15 = scalar_lea.vmem %s645_s13, 32 }
   0xc   :  { %731 = vmatprep.mubr.msk.f32.mxu0 %vm830_vm0, %v831_v6  ;;  %p806_p0 = scmp.ne.s32.totalorder %s645_s13, %s805_s14  ;;  %p810_p1 = scmp.lt.s32.totalorder %s645_s13, %s645_s13 }
   0xd   :  { %p811_p2 = scmp.lt.s32.totalorder %s809_s15, %s805_s14 }
   0xe   :  { %759 = vmatpush3.bf16.msra.mxu1 %v758_v17 }
   0xf   :  { %760 = vmatprep.subr.bf16.mxu1 %v829_v3  ;;  %p812_p3 = por %p811_p2, %p810_p1 }
  0x11   :  { %p813_p4 = pnand %p812_p3, %p806_p0 }
  0x12   :  { %762 = vmatpush3.bf16.msra.mxu1 %v761_v20 }
  0xde   :  { %v97_v22 = vpop.f32.mrb[0].mxu0 }
  0xdf   :  { %v98_v23 = vadd.f32 %v97_v22, %v26_v21  ;;  %v703_v24 = vpop.f32.mrb[1].mxu0 }
  0xe1   :  { %v101_v25 = vmax.f32 %v98_v23, 0.0 }
  0xe3   :  { %721 = vmatmul.mubr.msk.f32.vlgmr.msra.gmra.mrb[0].mxu1 %vm111_vm2, %v101_v25 }
 0x1b6   :  { %v181_v28 = vpop.f32.mrb[0].mxu1 }
 0x1b7   :  { %v182_v29 = vadd.f32 %v181_v28, %v110_v27  ;;  %v722_v30 = vpop.f32.mrb[1].mxu1 }
 0x1b9   :  { %v185_v31 = vmax.f32 %v182_v29, 0.0 }
 0x1bb   :  { %v932_v32 = vmul.f32 0.5, %v185_v31 }
 0x1bd   :  { %v190_v33 = vand.u32 2139095040, %v932_v32  ;;  %v187_v37 = vand.u32 2147483647, %v932_v32  ;;  %vm189_vm10 = vcmp.lt.s32.totalorder %v932_v32, 0 }
 0x1bf   :  { %v191_v34 = vshrl.u32 %v190_v33, 23  ;;  %v194_v40 = vand.u32 8388607, %v187_v37  ;;  %vm188_vm11 = vcmp.le.f32.partialorder %v187_v37, 0.7853982 }
 0x1c1   :  { %v654_v35 = vadd.s32 4294967169, %v191_v34  ;;  %v195_v59 = vor.u32 8388608, %v194_v40 }
 0x1c3   :  { %v197_v36 = vadd.s32 1, %v654_v35  ;;  %v235_v11 = vshll.u32 %v195_v59, 8 }
 0x1c5   :  { %vm198_vm3 = vcmp.gt.s32.totalorder %v197_v36, 0 }
 0x1c6   :  { %v199_v38 = vsel %vm198_vm3, %v197_v36, 0 }
 0x1c7   :  { %v201_v39 = vand.u32 31, %v199_v38  ;;  %v200_v42 = vshrl.u32 %v199_v38, 5 }
 0x1c9   :  { %v202_v41 = vsub.s32 32, %v201_v39  ;;  %v204_v44 = vshll.u32 %v833_v43, %v201_v39  ;;  %v207_v46 = vshll.u32 %v834_v45, %v201_v39  ;;  %v210_v50 = vshll.u32 %v835_v48, %v201_v39 }
 0x1ca   :  { %v213_v53 = vshll.u32 %v836_v51, %v201_v39  ;;  %v216_v56 = vshll.u32 %v837_v54, %v201_v39  ;;  %vm219_vm4 = vcmp.lt.s32.totalorder %v200_v42, 1  ;;  %vm222_vm5 = vcmp.lt.s32.totalorder %v200_v42, 4 }
 0x1cb   :  { %v205_v47 = vshrl.u32 %v834_v45, %v202_v41  ;;  %v208_v49 = vshrl.u32 %v835_v48, %v202_v41  ;;  %v211_v52 = vshrl.u32 %v836_v51, %v202_v41  ;;  %v214_v55 = vshrl.u32 %v837_v54, %v202_v41 }
 0x1cc   :  { %v217_v58 = vshrl.u32 %v838_v57, %v202_v41  ;;  %v203_v5 = vshrl.u32 %v833_v43, %v202_v41  ;;  %vm221_vm6 = vcmp.lt.s32.totalorder %v200_v42, 3  ;;  %vm220_vm7 = vcmp.lt.s32.totalorder %v200_v42, 2 }
 0x1cd   :  { %v206_v60 = vor.u32 %v205_v47, %v204_v44  ;;  %v209_v61 = vor.u32 %v208_v49, %v207_v46  ;;  %v212_v62 = vor.u32 %v211_v52, %v210_v50  ;;  %v215_v63 = vor.u32 %v214_v55, %v213_v53 }
 0x1ce   :  { %v218_v0 = vor.u32 %v217_v58, %v216_v56 }
 0x1cf   :  { %v224_v1 = vsel %vm222_vm5, %v212_v62, 2102212464  ;;  %v227_v2 = vsel %vm219_vm4, %v206_v60, %v209_v61  ;;  %v231_v4 = vsel %vm219_vm4, %v209_v61, %v212_v62  ;;  %v228_v7 = vsel %vm222_vm5, %v215_v63, 920167782 }
 0x1d0   :  { %v232_v8 = vsel %vm222_vm5, %v218_v0, 1326507024  ;;  %v229_v9 = vsel %vm221_vm6, %v212_v62, %v228_v7  ;;  %v223_v12 = vsel %vm219_vm4, %v203_v5, %v206_v60  ;;  %v225_v13 = vsel %vm221_vm6, %v209_v61, %v224_v1 }
 0x1d1   :  { %v233_v10 = vsel %vm221_vm6, %v215_v63, %v232_v8  ;;  %v230_v14 = vsel %vm220_vm7, %v227_v2, %v229_v9  ;;  %v226_v20 = vsel %vm220_vm7, %v223_v12, %v225_v13  ;;  %vm279_vm4 = vweird.f32 %v932_v32  ;;  %v482_v12 = vld [vmem:[%s1007_s3 + $0x10] sm:$0xff]  ;;  %v483_v13 = vld [vmem:[%s1007_s3 + $0x18] sm:$0xff] }
 0x1d2   :  { %v234_v15 = vsel %vm220_vm7, %v231_v4, %v233_v10  ;;  %v941_v18 = vmul.u32.u64.low %v235_v11, %v230_v14  ;;  %v942_v19 = vmul.u32.u64.high %v235_v11, %v230_v14, %v941_v18  ;;  %v242_v22 = vmul.u32 %v235_v11, %v226_v20  ;;  %v481_v10 = vld [vmem:[%s1007_s3 + $0x8] sm:$0xff] }
 0x1d3   :  { %v938_v16 = vmul.u32.u64.low %v235_v11, %v234_v15  ;;  %v939_v17 = vmul.u32.u64.high %v235_v11, %v234_v15, %v938_v16  ;;  %v839_v7 = vmov 1   ;;  %v840_v8 = vmov 2  }
 0x1d4   :  { %v245_v21 = vadd.s32 1, %v942_v19  ;;  %v841_v9 = vmov 3   ;;  %v767_v14 = vpack.c.bf16 %v483_v13, %v482_v12  ;;  %v394_v15 = vlaneseq }
 0x1d5   :  { %vm244_vm8 = vc.u32 %v939_v17, %v941_v18  ;;  %v243_v35 = vadd.s32 %v941_v18, %v939_v17 }
 0x1d6   :  { %v246_v23 = vsel %vm244_vm8, %v245_v21, %v942_v19  ;;  %v395_v16 = vand.u32 127, %v394_v15 }
 0x1d7   :  { %v247_v24 = vadd.s32 %v246_v23, %v242_v22 }
 0x1d8   :  { %v396_v17 = vand.u32 15, %v395_v16  ;;  %vm397_vm7 = vcmp.ge.s32.totalorder %v395_v16, 16 }
 0x1d9   :  { %v248_v25 = vadd.s32 536870912, %v247_v24 }
 0x1da   :  { %v415_v18 = vshra.s32 %v396_v17, 1  ;;  %v430_v19 = vshra.s32 %v396_v17, 2  ;;  %v400_v20 = vand.u32 1, %v396_v17 }
 0x1db   :  { %v249_v26 = vshrl.u32 %v248_v25, 30 }
 0x1dc   :  { %v416_v21 = vand.u32 1, %v415_v18  ;;  %v431_v23 = vand.u32 1, %v430_v19 }
 0x1dd   :  { %v250_v27 = vshll.u32 %v249_v26, 30  ;;  %v273_v48 = vsub.s32 4, %v249_v26 }
 0x1de   :  { %v417_v22 = vadd.s32 %v416_v21, %v400_v20 }
 0x1df   :  { %v251_v28 = vsub.s32 %v247_v24, %v250_v27  ;;  %v274_v51 = vsel %vm189_vm10, %v273_v48, %v249_v26  ;;  %v445_v24 = vshra.s32 %v396_v17, 3 }
 0x1e0   :  { %v276_v53 = vsel %vm188_vm11, 0, %v274_v51  ;;  %v432_v25 = vadd.s32 %v431_v23, %v417_v22 }
 0x1e1   :  { %v253_v29 = vsub.s32 0, %v251_v28  ;;  %v383_v54 = vadd.s32 3, %v276_v53  ;;  %v280_v55 = vand.u32 3, %v276_v53  ;;  %v446_v26 = vand.u32 1, %v445_v24 }
 0x1e3   :  { %v655_v30 = vmin.u32 %v253_v29, %v251_v28  ;;  %v384_v56 = vand.u32 3, %v383_v54  ;;  %vm285_vm12 = vcmp.eq.s32.totalorder %v280_v55, 2  ;;  %vm282_vm14 = vcmp.eq.s32.totalorder %v280_v55, 0 }
 0x1e4   :  { %vm281_vm2 = vcmp.lt.s32.totalorder %v280_v55, 2  ;;  %v447_v27 = vadd.s32 %v446_v26, %v432_v25  ;;  %v448_v53 = vcvt.s32.f32 %v446_v26 }
 0x1e5   :  { %v255_v31 = vclz %v655_v30  ;;  %vm389_vm13 = vcmp.eq.s32.totalorder %v384_v56, 2  ;;  %vm386_vm15 = vcmp.eq.s32.totalorder %v384_v56, 0  ;;  %vm385_vm3 = vcmp.lt.s32.totalorder %v384_v56, 2 }
 0x1e6   :  { %v460_v29 = vand.u32 3, %v447_v27 }
 0x1e7   :  { %v656_v33 = vadd.s32 4294967294, %v255_v31  ;;  %v418_v31 = vcvt.s32.f32 %v416_v21 }
 0x1e8   :  { %vm461_vm5 = vcmp.eq.s32.totalorder %v460_v29, 0  ;;  %vm464_vm6 = vcmp.eq.s32.totalorder %v460_v29, 2  ;;  %vm468_vm8 = vcmp.eq.s32.totalorder %v460_v29, 3 }
 0x1e9   :  { %vm657_vm9 = vcmp.lt.s32.totalorder %v656_v33, 0 }
 0x1ea   :  { %v258_v34 = vsel %vm657_vm9, 0, %v656_v33  ;;  %vm471_vm9 = vcmp.eq.s32.totalorder %v460_v29, 1 }
 0x1eb   :  { %v259_v36 = vsub.s32 32, %v258_v34  ;;  %v263_v38 = vsub.s32 4294967266, %v258_v34  ;;  %v260_v39 = vshll.u32 %v251_v28, %v258_v34  ;;  %v401_v34 = vcvt.s32.f32 %v400_v20 }
 0x1ed   :  { %v261_v40 = vshrl.u32 %v243_v35, %v259_v36  ;;  %v264_v41 = vadd.s32 127, %v263_v38  ;;  %v433_v38 = vcvt.s32.f32 %v431_v23 }
 0x1ef   :  { %v262_v42 = vor.u32 %v261_v40, %v260_v39  ;;  %v265_v43 = vshll.u32 %v264_v41, 23  ;;  %v663_v39 = vsel %vm461_vm5, 1.0, %v831_v6  ;;  %v664_v40 = vsel %vm464_vm6, 1.0, %v831_v6 }
 0x1f0   :  { %v662_v41 = vsel %vm397_vm7, 1.0, %v831_v6 }
 0x1f1   :  { %v266_v44 = vor.u32 4788187, %v265_v43  ;;  %v269_v46 = vcvt.s32.f32 %v262_v42  ;;  %v665_v42 = vsel %vm468_vm8, 1.0, %v831_v6  ;;  %v666_v43 = vsel %vm471_vm9, 1.0, %v831_v6 }
 0x1f3   :  { %v267_v45 = vand.u32 2147483647, %v266_v44 }
 0x1f5   :  { %v270_v47 = vmul.f32 %v269_v46, %v267_v45  ;;  %v467_v46 = vsub.f32 %v663_v39, %v664_v40 }
 0x1f7   :  { %v271_v49 = vxor.u32 2147483648, %v270_v47 }
 0x1f9   :  { %v272_v50 = vsel %vm189_vm10, %v271_v49, %v270_v47  ;;  %v474_v49 = vsub.f32 %v665_v42, %v666_v43 }
 0x1fa   :  { %v275_v52 = vsel %vm188_vm11, %v932_v32, %v272_v50  ;;  %v480_v32 = vld [vmem:[%s1007_s3] sm:$0xff]  ;;  %v475_v50 = vsub.f32 1.0, %v662_v41 }
 0x1fb   :  { %801 = vcosq.f32 %v275_v52  ;;  %v764_v11 = vpack.c.bf16 %v481_v10, %v480_v32 }
 0x1fc   :  { %803 = vsinq.f32 %v275_v52 }
 0x1fd   :  { %765 = vmatpush3.bf16.msra.mxu0 %v764_v11 }
 0x1fe   :  { %766 = vmatprep.subr.bf16.mxu0 %v829_v3 }
 0x201   :  { %768 = vmatpush3.bf16.msra.mxu0 %v767_v14 }
 0x202   :  { %769 = vmatprep.subr.bf16.mxu0 %v829_v3 }
 0x205   :  { %v802_v57 = vpop.eup %801 }
 0x206   :  { %v804_v58 = vpop.eup %803  ;;  %v286_v59 = vxor.u32 2147483648, %v802_v57 }
 0x207   :  { %v283_v60 = vxor.u32 2147483648, %v804_v58 }
 0x208   :  { %v287_v61 = vsel %vm285_vm12, %v286_v59, %v804_v58  ;;  %v391_v37 = vsel %vm389_vm13, %v286_v59, %v804_v58  ;;  %v477_v58 = vmul.f32 %v662_v41, %v474_v49 }
 0x209   :  { %v284_v62 = vsel %vm282_vm14, %v802_v57, %v283_v60  ;;  %v388_v63 = vsel %vm386_vm15, %v802_v57, %v283_v60  ;;  %v476_v57 = vmul.f32 %v475_v50, %v467_v46 }
 0x20a   :  { %v288_v0 = vsel %vm281_vm2, %v284_v62, %v287_v61  ;;  %v392_v1 = vsel %vm385_vm3, %v388_v63, %v391_v37  ;;  %v558_v63 = vld [vmem:[%s1008_s4] sm:$0xff] }
 0x20b   :  { %v289_v2 = vsel %vm279_vm4, nan, %v288_v0  ;;  %v393_v4 = vsel %vm279_vm4, nan, %v392_v1  ;;  %v478_v37 = vadd.f32 %v477_v58, %v476_v57  ;;  %v559_v0 = vld [vmem:[%s1008_s4 + $0x8] sm:$0xff] }
 0x20c   :  { %411 = vperm.xlu1 %793, %v289_v2   ;;  %v402_v5 = vsub.f32 %v393_v4, %v289_v2 }
 0x20e   :  { %405 = vperm.xlu0 %795, %v402_v5  }
 0x210   :  { %794 = vset.pattern.permute.xlu1 %v839_v7 }
 0x211   :  { %425 = vperm.xlu1 %794, %v289_v2  }
 0x212   :  { %796 = vset.pattern.permute.xlu0 %v839_v7  ;;  %v561_v7 = vld [vmem:[%s1008_s4 + $0x18] sm:$0xff] }
 0x213   :  { %420 = vperm.xlu0 %796, %v402_v5  }
 0x215   :  { %797 = vset.pattern.permute.xlu1 %v840_v8 }
 0x216   :  { %435 = vperm.xlu1 %797, %v402_v5  }
 0x217   :  { %798 = vset.pattern.permute.xlu0 %v840_v8 }
 0x218   :  { %440 = vperm.xlu0 %798, %v289_v2  }
 0x21a   :  { %799 = vset.pattern.permute.xlu1 %v841_v9 }
 0x21b   :  { %450 = vperm.xlu1 %799, %v402_v5   ;;  %v560_v5 = vld [vmem:[%s1008_s4 + $0x10] sm:$0xff] }
 0x21c   :  { %800 = vset.pattern.permute.xlu0 %v841_v9  ;;  %v773_v8 = vpack.c.bf16 %v561_v7, %v560_v5 }
 0x21f   :  { %455 = vperm.xlu1 %799, %v289_v2   ;;  %v770_v2 = vpack.c.bf16 %v559_v0, %v558_v63 }
 0x28b   :  { %v412_v28 = vpop.permute.xlu1 %411 }
 0x28d   :  { %v406_v30 = vpop.permute.xlu0 %405 }
 0x28e   :  { %v408_v44 = vmul.f32 %v406_v30, %v401_v34 }
 0x290   :  { %v426_v33 = vpop.permute.xlu1 %425  ;;  %v414_v52 = vadd.f32 %v412_v28, %v408_v44 }
 0x292   :  { %v421_v35 = vpop.permute.xlu0 %420 }
 0x293   :  { %v423_v36 = vmul.f32 %v421_v35, %v418_v31 }
 0x295   :  { %v436_v45 = vpop.permute.xlu1 %435  ;;  %v428_v47 = vadd.f32 %v426_v33, %v423_v36 }
 0x296   :  { %v438_v48 = vmul.f32 %v436_v45, %v433_v38 }
 0x297   :  { %v441_v51 = vpop.permute.xlu0 %440  ;;  %v429_v55 = vmul.f32 %v428_v47, %v414_v52 }
 0x298   :  { %v443_v56 = vadd.f32 %v441_v51, %v438_v48 }
 0x29a   :  { %v451_v54 = vpop.permute.xlu1 %450  ;;  %v444_v61 = vmul.f32 %v443_v56, %v429_v55 }
 0x29b   :  { %v453_v59 = vmul.f32 %v451_v54, %v448_v53 }
 0x29e   :  { %v456_v60 = vpop.permute.xlu1 %455 }
 0x29f   :  { %v458_v62 = vadd.f32 %v456_v60, %v453_v59 }
 0x2a1   :  { %v459_v1 = vmul.f32 %v458_v62, %v444_v61 }
 0x2a3   :  { %v479_v4 = vmul.f32 %v478_v37, %v459_v1 }
 0x2a5   :  { %732 = vmatmul.mubr.msk.f32.vlgmr.msra.gmra.mrb[2].mxu0 %vm27_vm1, %v479_v4 }
 0x2a6   :  { %771 = vmatpush3.bf16.msra.mxu0 %v770_v2  ;;  %742 = vmatprep.mubr.msk.f32.mxu0 %vm830_vm0, %v831_v6  ;;  %v562_v6 = vld [vmem:[%s1008_s4 + $0x20] sm:$0x1]  ;;  %vm636_vm0 = vcmask 57344  }
 0x2a7   :  { %772 = vmatprep.subr.bf16.mxu0 %v829_v3 }
 0x2aa   :  { %774 = vmatpush3.bf16.msra.mxu0 %v773_v8 }
 0x378   :  { %v553_v9 = vpop.f32.mrb[2].mxu0 }
 0x379   :  { %v557_v32 = vmul.f32 %v553_v9, %v553_v9  ;;  %v733_v10 = vpop.f32.mrb[3].mxu0 }
 0x37b   :  { %743 = vmatmul.mubr.msk.f32.vlgmr.msra.gmra.mrb[4].mxu0 %vm27_vm1, %v557_v32 }
 0x44e   :  { %v632_v3 = vpop.f32.mrb[4].mxu0 }
 0x44f   :  { %v633_v11 = vadd.f32 %v632_v3, %v562_v6  ;;  %v744_v12 = vpop.f32.mrb[5].mxu0 }
 0x451   :  { %637 = vst.msk [vmem:[#allocation2] sm:$0x1] %vm636_vm0, %v633_v11 }
 0x452   :  { %816 = shalt.err (!%p813_p4)
}
 0x453   :  { %s817_s4 = scalar_lea.hbm %s1009_s5, 16 }
 0x454   :  { %p818_p5 = scmp.ne.s32.totalorder %s1009_s5, %s817_s4  ;;  %p821_p6 = scmp.lt.u32.totalorder %s817_s4, %s1009_s5 }
 0x456   :  { %p823_p7 = pnand %p821_p6, %p818_p5 }
 0x458   :  { %826 = shalt.err (!%p823_p7)
}
 0x459   :  { %647 = dma.vmem_to_hbm [thread:$0]  %s645_s13, 16, %s1009_s5, [#allocation3]  }
 0x45a   :  { %827 = dma.done.wait [#allocation3], 16  }
 0x45b   :  { %828 = vsyncadd [#allocation3], 4294967280 }
 0x45c   :  { %651 = vsyncpa [#allocation3], 1 }

</bundles_post_ra>
